<compile_context>
chip_gen: v7x
topology: tpu7x:2x2x1
jax: 0.10.0
libtpu: 0.0.40
codegen_flags: <defaults>
</compile_context>

<pallas_src>
import functools

import jax
import jax.numpy as jnp
import numpy as np
from jax.experimental import pallas as pl
from jax.experimental.pallas import tpu as pltpu

_LANE = 128
_SUBLANE = 8


def _round_up(x, m):
    return ((x + m - 1) // m) * m


def _gather_rows_kernel(idx_ref, table_hbm, out_ref, sem, *, tn):
    """Manual DMA gather of `tn` table rows into one output block.

    idx_ref:   (N_pad,)  int32 in SMEM (scalar prefetch)
    table_hbm: (V, Dp)   table ref left in HBM (memory_space=pl.ANY)
    out_ref:   (tn, Dp)  VMEM output block (rows g*tn .. g*tn + tn - 1)
    sem:       (tn,)     DMA semaphores
    """
    base = pl.program_id(0) * tn
    copies = []
    # Issue all row DMAs first so they are all in flight simultaneously ...
    for i in range(tn):
        row = idx_ref[base + i]
        cp = pltpu.make_async_copy(
            table_hbm.at[pl.ds(row, 1), :],
            out_ref.at[pl.ds(i, 1), :],
            sem.at[i],
        )
        cp.start()
        copies.append(cp)
    # ... then wait for all of them; the output block is complete afterwards.
    for cp in copies:
        cp.wait()


@functools.partial(jax.jit, static_argnames=("out_dim",))
def _speaker_embedding_lookup(indices, padded_table, out_dim):
    """[N] int indices, [V, Dp] lane-padded table -> [N, out_dim] embeddings."""
    n = indices.shape[0]
    v, dp = padded_table.shape

    if n == 0:
        return jnp.zeros((0, out_dim), dtype=padded_table.dtype)

    # TODO(synk): PyTorch nn.Embedding raises on out-of-range indices; clamping
    # here avoids an OOB DMA fault on device instead.
    idx = jnp.clip(indices.astype(jnp.int32), 0, v - 1)

    tn = _SUBLANE                      # 8 rows per grid step (sublane-full)
    n_pad = _round_up(n, tn)
    if n_pad != n:
        idx = jnp.pad(idx, (0, n_pad - n))   # padded rows gather row 0; sliced off

    out = pl.pallas_call(
        functools.partial(_gather_rows_kernel, tn=tn),
        out_shape=jax.ShapeDtypeStruct((n_pad, dp), padded_table.dtype),
        grid_spec=pltpu.PrefetchScalarGridSpec(
            num_scalar_prefetch=1,
            grid=(n_pad // tn,),
            in_specs=[pl.BlockSpec(memory_space=pl.ANY)],   # table stays in HBM
            out_specs=pl.BlockSpec((tn, dp), lambda g, idx_ref: (g, 0)),
            scratch_shapes=[pltpu.SemaphoreType.DMA((tn,))],
        ),
        compiler_params=pltpu.CompilerParams(
            dimension_semantics=("parallel",),
        ),
    )(idx, padded_table)

    return out[:n, :out_dim]


class SpeakerEmbedding:
    """JAX/Pallas port of the PyTorch SpeakerEmbedding module.

    The host-side Python dict mapping arbitrary speaker ids to dense indices
    (num_speakers=None case) and the table-growth logic are plain-Python glue,
    exactly like the original module; the embedding gather runs in the Pallas
    kernel.
    """

    def __init__(self, embedding_dim, num_speakers=None, key=None):
        self.embedding_dim = embedding_dim
        self.num_speakers = num_speakers
        self.speaker_to_idx = {}
        self.next_idx = 0
        if key is None:
            key = jax.random.PRNGKey(0)
        self._key, init_key = jax.random.split(key)
        init_rows = num_speakers if num_speakers is not None else 2
        # nn.Embedding default init: weight ~ N(0, 1)
        self.weight = jax.random.normal(
            init_key, (init_rows, embedding_dim), dtype=jnp.float32
        )
        self._padded_dim = max(_LANE, _round_up(embedding_dim, _LANE))
        self._padded_weight = self._pad(self.weight)

    def _pad(self, w):
        d = w.shape[1]
        if d == self._padded_dim:
            return w
        return jnp.pad(w, ((0, 0), (0, self._padded_dim - d)))

    def _expand_embedding_if_needed(self, max_id):
        current = self.weight.shape[0]
        if max_id >= current:
            new_size = max(max_id + 1, current * 2)
            # Fresh key per expansion (don't reuse randomness between growths).
            self._key, sub = jax.random.split(self._key)
            new_w = jax.random.normal(
                sub, (new_size, self.embedding_dim), dtype=jnp.float32
            )
            self.weight = new_w.at[:current].set(self.weight)
            self._padded_weight = self._pad(self.weight)

    def __call__(self, speaker_ids):
        if isinstance(speaker_ids, list):
            if self.num_speakers is None:
                indices = []
                for sid in speaker_ids:
                    if sid not in self.speaker_to_idx:
                        self.speaker_to_idx[sid] = self.next_idx
                        self.next_idx += 1
                    indices.append(self.speaker_to_idx[sid])
                max_idx = max(indices) if indices else -1
                self._expand_embedding_if_needed(max_idx)
                idx = jnp.asarray(indices, dtype=jnp.int32)
            else:
                idx = jnp.asarray(speaker_ids, dtype=jnp.int32)
        else:
            if self.num_speakers is None:
                # Dynamic id remapping needs host-side values (torch does
                # .unique().cpu().tolist()); only possible for concrete arrays.
                try:
                    host_ids = np.asarray(
                        jax.device_get(speaker_ids)
                    ).reshape(-1).tolist()
                    return self(host_ids)
                except Exception:
                    # TODO(synk): traced tensor inputs can't be remapped
                    # host-side; used as direct indices instead.
                    pass
            idx = jnp.asarray(speaker_ids, dtype=jnp.int32)
        return _speaker_embedding_lookup(idx, self._padded_weight, self.embedding_dim)


if __name__ == "__main__":
    key = jax.random.PRNGKey(0)
    k_w, k_idx = jax.random.split(key)

    num_speakers = 4
    embedding_dim = 32
    n_lookups = 8

    # --- fixed-size table path (tensor input) ---
    module = SpeakerEmbedding(embedding_dim, num_speakers=num_speakers, key=k_w)
    speaker_ids = jax.random.randint(
        k_idx, (n_lookups,), 0, num_speakers, dtype=jnp.int32
    )
    out = module(speaker_ids)
    out = jax.block_until_ready(out)

    ref = jnp.take(module.weight, speaker_ids, axis=0)
    assert out.shape == (n_lookups, embedding_dim)
    assert jnp.allclose(out, ref, atol=1e-6, rtol=1e-6)

    # --- dynamic speaker-id path (list input, table growth) ---
    module2 = SpeakerEmbedding(embedding_dim, num_speakers=None, key=k_w)
    out2 = module2(["alice", "bob", "alice", "carol"])
    out2 = jax.block_until_ready(out2)
    idx2 = jnp.asarray([0, 1, 0, 2], dtype=jnp.int32)
    ref2 = jnp.take(module2.weight, idx2, axis=0)
    assert out2.shape == (4, embedding_dim)
    assert jnp.allclose(out2, ref2, atol=1e-6, rtol=1e-6)
    assert jnp.allclose(out2[0], out2[2], atol=1e-6)

    # --- dynamic speaker-id path (concrete tensor input, host remap + growth) ---
    out3 = module2(jnp.asarray([10, 11, 10], dtype=jnp.int32))
    out3 = jax.block_until_ready(out3)
    idx3 = jnp.asarray(
        [module2.speaker_to_idx[10], module2.speaker_to_idx[11],
         module2.speaker_to_idx[10]], dtype=jnp.int32)
    ref3 = jnp.take(module2.weight, idx3, axis=0)
    assert out3.shape == (3, embedding_dim)
    assert jnp.allclose(out3, ref3, atol=1e-6, rtol=1e-6)
    assert jnp.allclose(out3[0], out3[2], atol=1e-6)

    print("KERNEL_OK")
</pallas_src>

<mosaic_0001>
module attributes {stable_mosaic.version = 11 : i64} {
  func.func @_gather_rows_kernel(%arg0: i32, %arg1: memref<8xi32, #tpu.memory_space<smem>>, %arg2: memref<4x128xf32, #tpu.memory_space<any>>, %arg3: memref<8x128xf32, #tpu.memory_space<vmem>>, %arg4: memref<8x!tpu.dma_semaphore, #tpu.memory_space<semaphore_mem>>) attributes {dimension_semantics = [#tpu.dimension_semantics<parallel>], iteration_bounds = array<i64: 1>, scalar_prefetch = 1 : i64, scratch_operands = 1 : i64, tpu.core_type = #tpu.core_type<tc>, window_params = [{}, {transform_indices = @transform_1, window_bounds = array<i64: 8, 128>}]} {
    %c8_i32 = arith.constant 8 : i32
    %0 = arith.muli %arg0, %c8_i32 : i32
    %c0_i32 = arith.constant 0 : i32
    %1 = arith.addi %0, %c0_i32 : i32
    %2 = arith.index_cast %1 : i32 to index
    %3 = memref.load %arg1[%2] : memref<8xi32, #tpu.memory_space<smem>>
    %c0_i32_0 = arith.constant 0 : i32
    %c0_i32_1 = arith.constant 0 : i32
    %4 = tpu.memref_slice %arg2[%3, %c0_i32_1] : memref<4x128xf32, #tpu.memory_space<any>> -> memref<1x128xf32, #tpu.memory_space<any>>
    %c0_i32_2 = arith.constant 0 : i32
    %c0_i32_3 = arith.constant 0 : i32
    %5 = tpu.memref_slice %arg3[%c0_i32_2, %c0_i32_3] : memref<8x128xf32, #tpu.memory_space<vmem>> -> memref<1x128xf32, #tpu.memory_space<vmem>>
    %6 = tpu.memref_slice %arg4[%c0_i32_0] : memref<8x!tpu.dma_semaphore, #tpu.memory_space<semaphore_mem>> -> memref<1x!tpu.dma_semaphore, #tpu.memory_space<semaphore_mem>>
    %7 = tpu.memref_squeeze %6 : memref<1x!tpu.dma_semaphore, #tpu.memory_space<semaphore_mem>> -> memref<!tpu.dma_semaphore, #tpu.memory_space<semaphore_mem>>
    tpu.enqueue_dma source(%4 : memref<1x128xf32, #tpu.memory_space<any>>) target(%5 : memref<1x128xf32, #tpu.memory_space<vmem>>) target_semaphore(%7 : memref<!tpu.dma_semaphore, #tpu.memory_space<semaphore_mem>>)
    %c1_i32 = arith.constant 1 : i32
    %8 = arith.addi %0, %c1_i32 : i32
    %9 = arith.index_cast %8 : i32 to index
    %10 = memref.load %arg1[%9] : memref<8xi32, #tpu.memory_space<smem>>
    %c1_i32_4 = arith.constant 1 : i32
    %c0_i32_5 = arith.constant 0 : i32
    %11 = tpu.memref_slice %arg2[%10, %c0_i32_5] : memref<4x128xf32, #tpu.memory_space<any>> -> memref<1x128xf32, #tpu.memory_space<any>>
    %c1_i32_6 = arith.constant 1 : i32
    %c0_i32_7 = arith.constant 0 : i32
    %12 = tpu.memref_slice %arg3[%c1_i32_6, %c0_i32_7] : memref<8x128xf32, #tpu.memory_space<vmem>> -> memref<1x128xf32, #tpu.memory_space<vmem>>
    %13 = tpu.memref_slice %arg4[%c1_i32_4] : memref<8x!tpu.dma_semaphore, #tpu.memory_space<semaphore_mem>> -> memref<1x!tpu.dma_semaphore, #tpu.memory_space<semaphore_mem>>
    %14 = tpu.memref_squeeze %13 : memref<1x!tpu.dma_semaphore, #tpu.memory_space<semaphore_mem>> -> memref<!tpu.dma_semaphore, #tpu.memory_space<semaphore_mem>>
    tpu.enqueue_dma source(%11 : memref<1x128xf32, #tpu.memory_space<any>>) target(%12 : memref<1x128xf32, #tpu.memory_space<vmem>>) target_semaphore(%14 : memref<!tpu.dma_semaphore, #tpu.memory_space<semaphore_mem>>)
    %c2_i32 = arith.constant 2 : i32
    %15 = arith.addi %0, %c2_i32 : i32
    %16 = arith.index_cast %15 : i32 to index
    %17 = memref.load %arg1[%16] : memref<8xi32, #tpu.memory_space<smem>>
    %c2_i32_8 = arith.constant 2 : i32
    %c0_i32_9 = arith.constant 0 : i32
    %18 = tpu.memref_slice %arg2[%17, %c0_i32_9] : memref<4x128xf32, #tpu.memory_space<any>> -> memref<1x128xf32, #tpu.memory_space<any>>
    %c2_i32_10 = arith.constant 2 : i32
    %c0_i32_11 = arith.constant 0 : i32
    %19 = tpu.memref_slice %arg3[%c2_i32_10, %c0_i32_11] : memref<8x128xf32, #tpu.memory_space<vmem>> -> memref<1x128xf32, #tpu.memory_space<vmem>>
    %20 = tpu.memref_slice %arg4[%c2_i32_8] : memref<8x!tpu.dma_semaphore, #tpu.memory_space<semaphore_mem>> -> memref<1x!tpu.dma_semaphore, #tpu.memory_space<semaphore_mem>>
    %21 = tpu.memref_squeeze %20 : memref<1x!tpu.dma_semaphore, #tpu.memory_space<semaphore_mem>> -> memref<!tpu.dma_semaphore, #tpu.memory_space<semaphore_mem>>
    tpu.enqueue_dma source(%18 : memref<1x128xf32, #tpu.memory_space<any>>) target(%19 : memref<1x128xf32, #tpu.memory_space<vmem>>) target_semaphore(%21 : memref<!tpu.dma_semaphore, #tpu.memory_space<semaphore_mem>>)
    %c3_i32 = arith.constant 3 : i32
    %22 = arith.addi %0, %c3_i32 : i32
    %23 = arith.index_cast %22 : i32 to index
    %24 = memref.load %arg1[%23] : memref<8xi32, #tpu.memory_space<smem>>
    %c3_i32_12 = arith.constant 3 : i32
    %c0_i32_13 = arith.constant 0 : i32
    %25 = tpu.memref_slice %arg2[%24, %c0_i32_13] : memref<4x128xf32, #tpu.memory_space<any>> -> memref<1x128xf32, #tpu.memory_space<any>>
    %c3_i32_14 = arith.constant 3 : i32
    %c0_i32_15 = arith.constant 0 : i32
    %26 = tpu.memref_slice %arg3[%c3_i32_14, %c0_i32_15] : memref<8x128xf32, #tpu.memory_space<vmem>> -> memref<1x128xf32, #tpu.memory_space<vmem>>
    %27 = tpu.memref_slice %arg4[%c3_i32_12] : memref<8x!tpu.dma_semaphore, #tpu.memory_space<semaphore_mem>> -> memref<1x!tpu.dma_semaphore, #tpu.memory_space<semaphore_mem>>
    %28 = tpu.memref_squeeze %27 : memref<1x!tpu.dma_semaphore, #tpu.memory_space<semaphore_mem>> -> memref<!tpu.dma_semaphore, #tpu.memory_space<semaphore_mem>>
    tpu.enqueue_dma source(%25 : memref<1x128xf32, #tpu.memory_space<any>>) target(%26 : memref<1x128xf32, #tpu.memory_space<vmem>>) target_semaphore(%28 : memref<!tpu.dma_semaphore, #tpu.memory_space<semaphore_mem>>)
    %c4_i32 = arith.constant 4 : i32
    %29 = arith.addi %0, %c4_i32 : i32
    %30 = arith.index_cast %29 : i32 to index
    %31 = memref.load %arg1[%30] : memref<8xi32, #tpu.memory_space<smem>>
    %c4_i32_16 = arith.constant 4 : i32
    %c0_i32_17 = arith.constant 0 : i32
    %32 = tpu.memref_slice %arg2[%31, %c0_i32_17] : memref<4x128xf32, #tpu.memory_space<any>> -> memref<1x128xf32, #tpu.memory_space<any>>
    %c4_i32_18 = arith.constant 4 : i32
    %c0_i32_19 = arith.constant 0 : i32
    %33 = tpu.memref_slice %arg3[%c4_i32_18, %c0_i32_19] : memref<8x128xf32, #tpu.memory_space<vmem>> -> memref<1x128xf32, #tpu.memory_space<vmem>>
    %34 = tpu.memref_slice %arg4[%c4_i32_16] : memref<8x!tpu.dma_semaphore, #tpu.memory_space<semaphore_mem>> -> memref<1x!tpu.dma_semaphore, #tpu.memory_space<semaphore_mem>>
    %35 = tpu.memref_squeeze %34 : memref<1x!tpu.dma_semaphore, #tpu.memory_space<semaphore_mem>> -> memref<!tpu.dma_semaphore, #tpu.memory_space<semaphore_mem>>
    tpu.enqueue_dma source(%32 : memref<1x128xf32, #tpu.memory_space<any>>) target(%33 : memref<1x128xf32, #tpu.memory_space<vmem>>) target_semaphore(%35 : memref<!tpu.dma_semaphore, #tpu.memory_space<semaphore_mem>>)
    %c5_i32 = arith.constant 5 : i32
    %36 = arith.addi %0, %c5_i32 : i32
    %37 = arith.index_cast %36 : i32 to index
    %38 = memref.load %arg1[%37] : memref<8xi32, #tpu.memory_space<smem>>
    %c5_i32_20 = arith.constant 5 : i32
    %c0_i32_21 = arith.constant 0 : i32
    %39 = tpu.memref_slice %arg2[%38, %c0_i32_21] : memref<4x128xf32, #tpu.memory_space<any>> -> memref<1x128xf32, #tpu.memory_space<any>>
    %c5_i32_22 = arith.constant 5 : i32
    %c0_i32_23 = arith.constant 0 : i32
    %40 = tpu.memref_slice %arg3[%c5_i32_22, %c0_i32_23] : memref<8x128xf32, #tpu.memory_space<vmem>> -> memref<1x128xf32, #tpu.memory_space<vmem>>
    %41 = tpu.memref_slice %arg4[%c5_i32_20] : memref<8x!tpu.dma_semaphore, #tpu.memory_space<semaphore_mem>> -> memref<1x!tpu.dma_semaphore, #tpu.memory_space<semaphore_mem>>
    %42 = tpu.memref_squeeze %41 : memref<1x!tpu.dma_semaphore, #tpu.memory_space<semaphore_mem>> -> memref<!tpu.dma_semaphore, #tpu.memory_space<semaphore_mem>>
    tpu.enqueue_dma source(%39 : memref<1x128xf32, #tpu.memory_space<any>>) target(%40 : memref<1x128xf32, #tpu.memory_space<vmem>>) target_semaphore(%42 : memref<!tpu.dma_semaphore, #tpu.memory_space<semaphore_mem>>)
    %c6_i32 = arith.constant 6 : i32
    %43 = arith.addi %0, %c6_i32 : i32
    %44 = arith.index_cast %43 : i32 to index
    %45 = memref.load %arg1[%44] : memref<8xi32, #tpu.memory_space<smem>>
    %c6_i32_24 = arith.constant 6 : i32
    %c0_i32_25 = arith.constant 0 : i32
    %46 = tpu.memref_slice %arg2[%45, %c0_i32_25] : memref<4x128xf32, #tpu.memory_space<any>> -> memref<1x128xf32, #tpu.memory_space<any>>
    %c6_i32_26 = arith.constant 6 : i32
    %c0_i32_27 = arith.constant 0 : i32
    %47 = tpu.memref_slice %arg3[%c6_i32_26, %c0_i32_27] : memref<8x128xf32, #tpu.memory_space<vmem>> -> memref<1x128xf32, #tpu.memory_space<vmem>>
    %48 = tpu.memref_slice %arg4[%c6_i32_24] : memref<8x!tpu.dma_semaphore, #tpu.memory_space<semaphore_mem>> -> memref<1x!tpu.dma_semaphore, #tpu.memory_space<semaphore_mem>>
    %49 = tpu.memref_squeeze %48 : memref<1x!tpu.dma_semaphore, #tpu.memory_space<semaphore_mem>> -> memref<!tpu.dma_semaphore, #tpu.memory_space<semaphore_mem>>
    tpu.enqueue_dma source(%46 : memref<1x128xf32, #tpu.memory_space<any>>) target(%47 : memref<1x128xf32, #tpu.memory_space<vmem>>) target_semaphore(%49 : memref<!tpu.dma_semaphore, #tpu.memory_space<semaphore_mem>>)
    %c7_i32 = arith.constant 7 : i32
    %50 = arith.addi %0, %c7_i32 : i32
    %51 = arith.index_cast %50 : i32 to index
    %52 = memref.load %arg1[%51] : memref<8xi32, #tpu.memory_space<smem>>
    %c7_i32_28 = arith.constant 7 : i32
    %c0_i32_29 = arith.constant 0 : i32
    %53 = tpu.memref_slice %arg2[%52, %c0_i32_29] : memref<4x128xf32, #tpu.memory_space<any>> -> memref<1x128xf32, #tpu.memory_space<any>>
    %c7_i32_30 = arith.constant 7 : i32
    %c0_i32_31 = arith.constant 0 : i32
    %54 = tpu.memref_slice %arg3[%c7_i32_30, %c0_i32_31] : memref<8x128xf32, #tpu.memory_space<vmem>> -> memref<1x128xf32, #tpu.memory_space<vmem>>
    %55 = tpu.memref_slice %arg4[%c7_i32_28] : memref<8x!tpu.dma_semaphore, #tpu.memory_space<semaphore_mem>> -> memref<1x!tpu.dma_semaphore, #tpu.memory_space<semaphore_mem>>
    %56 = tpu.memref_squeeze %55 : memref<1x!tpu.dma_semaphore, #tpu.memory_space<semaphore_mem>> -> memref<!tpu.dma_semaphore, #tpu.memory_space<semaphore_mem>>
    tpu.enqueue_dma source(%53 : memref<1x128xf32, #tpu.memory_space<any>>) target(%54 : memref<1x128xf32, #tpu.memory_space<vmem>>) target_semaphore(%56 : memref<!tpu.dma_semaphore, #tpu.memory_space<semaphore_mem>>)
    %c0_i32_32 = arith.constant 0 : i32
    %c0_i32_33 = arith.constant 0 : i32
    %57 = tpu.memref_slice %arg2[%3, %c0_i32_33] : memref<4x128xf32, #tpu.memory_space<any>> -> memref<1x128xf32, #tpu.memory_space<any>>
    %c0_i32_34 = arith.constant 0 : i32
    %c0_i32_35 = arith.constant 0 : i32
    %58 = tpu.memref_slice %arg3[%c0_i32_34, %c0_i32_35] : memref<8x128xf32, #tpu.memory_space<vmem>> -> memref<1x128xf32, #tpu.memory_space<vmem>>
    %59 = tpu.memref_slice %arg4[%c0_i32_32] : memref<8x!tpu.dma_semaphore, #tpu.memory_space<semaphore_mem>> -> memref<1x!tpu.dma_semaphore, #tpu.memory_space<semaphore_mem>>
    %60 = tpu.memref_squeeze %59 : memref<1x!tpu.dma_semaphore, #tpu.memory_space<semaphore_mem>> -> memref<!tpu.dma_semaphore, #tpu.memory_space<semaphore_mem>>
    tpu.wait_dma2 semaphore(%60 : memref<!tpu.dma_semaphore, #tpu.memory_space<semaphore_mem>>) src(%57 : memref<1x128xf32, #tpu.memory_space<any>>) dst(%58 : memref<1x128xf32, #tpu.memory_space<vmem>>)
    %c1_i32_36 = arith.constant 1 : i32
    %c0_i32_37 = arith.constant 0 : i32
    %61 = tpu.memref_slice %arg2[%10, %c0_i32_37] : memref<4x128xf32, #tpu.memory_space<any>> -> memref<1x128xf32, #tpu.memory_space<any>>
    %c1_i32_38 = arith.constant 1 : i32
    %c0_i32_39 = arith.constant 0 : i32
    %62 = tpu.memref_slice %arg3[%c1_i32_38, %c0_i32_39] : memref<8x128xf32, #tpu.memory_space<vmem>> -> memref<1x128xf32, #tpu.memory_space<vmem>>
    %63 = tpu.memref_slice %arg4[%c1_i32_36] : memref<8x!tpu.dma_semaphore, #tpu.memory_space<semaphore_mem>> -> memref<1x!tpu.dma_semaphore, #tpu.memory_space<semaphore_mem>>
    %64 = tpu.memref_squeeze %63 : memref<1x!tpu.dma_semaphore, #tpu.memory_space<semaphore_mem>> -> memref<!tpu.dma_semaphore, #tpu.memory_space<semaphore_mem>>
    tpu.wait_dma2 semaphore(%64 : memref<!tpu.dma_semaphore, #tpu.memory_space<semaphore_mem>>) src(%61 : memref<1x128xf32, #tpu.memory_space<any>>) dst(%62 : memref<1x128xf32, #tpu.memory_space<vmem>>)
    %c2_i32_40 = arith.constant 2 : i32
    %c0_i32_41 = arith.constant 0 : i32
    %65 = tpu.memref_slice %arg2[%17, %c0_i32_41] : memref<4x128xf32, #tpu.memory_space<any>> -> memref<1x128xf32, #tpu.memory_space<any>>
    %c2_i32_42 = arith.constant 2 : i32
    %c0_i32_43 = arith.constant 0 : i32
    %66 = tpu.memref_slice %arg3[%c2_i32_42, %c0_i32_43] : memref<8x128xf32, #tpu.memory_space<vmem>> -> memref<1x128xf32, #tpu.memory_space<vmem>>
    %67 = tpu.memref_slice %arg4[%c2_i32_40] : memref<8x!tpu.dma_semaphore, #tpu.memory_space<semaphore_mem>> -> memref<1x!tpu.dma_semaphore, #tpu.memory_space<semaphore_mem>>
    %68 = tpu.memref_squeeze %67 : memref<1x!tpu.dma_semaphore, #tpu.memory_space<semaphore_mem>> -> memref<!tpu.dma_semaphore, #tpu.memory_space<semaphore_mem>>
    tpu.wait_dma2 semaphore(%68 : memref<!tpu.dma_semaphore, #tpu.memory_space<semaphore_mem>>) src(%65 : memref<1x128xf32, #tpu.memory_space<any>>) dst(%66 : memref<1x128xf32, #tpu.memory_space<vmem>>)
    %c3_i32_44 = arith.constant 3 : i32
    %c0_i32_45 = arith.constant 0 : i32
    %69 = tpu.memref_slice %arg2[%24, %c0_i32_45] : memref<4x128xf32, #tpu.memory_space<any>> -> memref<1x128xf32, #tpu.memory_space<any>>
    %c3_i32_46 = arith.constant 3 : i32
    %c0_i32_47 = arith.constant 0 : i32
    %70 = tpu.memref_slice %arg3[%c3_i32_46, %c0_i32_47] : memref<8x128xf32, #tpu.memory_space<vmem>> -> memref<1x128xf32, #tpu.memory_space<vmem>>
    %71 = tpu.memref_slice %arg4[%c3_i32_44] : memref<8x!tpu.dma_semaphore, #tpu.memory_space<semaphore_mem>> -> memref<1x!tpu.dma_semaphore, #tpu.memory_space<semaphore_mem>>
    %72 = tpu.memref_squeeze %71 : memref<1x!tpu.dma_semaphore, #tpu.memory_space<semaphore_mem>> -> memref<!tpu.dma_semaphore, #tpu.memory_space<semaphore_mem>>
    tpu.wait_dma2 semaphore(%72 : memref<!tpu.dma_semaphore, #tpu.memory_space<semaphore_mem>>) src(%69 : memref<1x128xf32, #tpu.memory_space<any>>) dst(%70 : memref<1x128xf32, #tpu.memory_space<vmem>>)
    %c4_i32_48 = arith.constant 4 : i32
    %c0_i32_49 = arith.constant 0 : i32
    %73 = tpu.memref_slice %arg2[%31, %c0_i32_49] : memref<4x128xf32, #tpu.memory_space<any>> -> memref<1x128xf32, #tpu.memory_space<any>>
    %c4_i32_50 = arith.constant 4 : i32
    %c0_i32_51 = arith.constant 0 : i32
    %74 = tpu.memref_slice %arg3[%c4_i32_50, %c0_i32_51] : memref<8x128xf32, #tpu.memory_space<vmem>> -> memref<1x128xf32, #tpu.memory_space<vmem>>
    %75 = tpu.memref_slice %arg4[%c4_i32_48] : memref<8x!tpu.dma_semaphore, #tpu.memory_space<semaphore_mem>> -> memref<1x!tpu.dma_semaphore, #tpu.memory_space<semaphore_mem>>
    %76 = tpu.memref_squeeze %75 : memref<1x!tpu.dma_semaphore, #tpu.memory_space<semaphore_mem>> -> memref<!tpu.dma_semaphore, #tpu.memory_space<semaphore_mem>>
    tpu.wait_dma2 semaphore(%76 : memref<!tpu.dma_semaphore, #tpu.memory_space<semaphore_mem>>) src(%73 : memref<1x128xf32, #tpu.memory_space<any>>) dst(%74 : memref<1x128xf32, #tpu.memory_space<vmem>>)
    %c5_i32_52 = arith.constant 5 : i32
    %c0_i32_53 = arith.constant 0 : i32
    %77 = tpu.memref_slice %arg2[%38, %c0_i32_53] : memref<4x128xf32, #tpu.memory_space<any>> -> memref<1x128xf32, #tpu.memory_space<any>>
    %c5_i32_54 = arith.constant 5 : i32
    %c0_i32_55 = arith.constant 0 : i32
    %78 = tpu.memref_slice %arg3[%c5_i32_54, %c0_i32_55] : memref<8x128xf32, #tpu.memory_space<vmem>> -> memref<1x128xf32, #tpu.memory_space<vmem>>
    %79 = tpu.memref_slice %arg4[%c5_i32_52] : memref<8x!tpu.dma_semaphore, #tpu.memory_space<semaphore_mem>> -> memref<1x!tpu.dma_semaphore, #tpu.memory_space<semaphore_mem>>
    %80 = tpu.memref_squeeze %79 : memref<1x!tpu.dma_semaphore, #tpu.memory_space<semaphore_mem>> -> memref<!tpu.dma_semaphore, #tpu.memory_space<semaphore_mem>>
    tpu.wait_dma2 semaphore(%80 : memref<!tpu.dma_semaphore, #tpu.memory_space<semaphore_mem>>) src(%77 : memref<1x128xf32, #tpu.memory_space<any>>) dst(%78 : memref<1x128xf32, #tpu.memory_space<vmem>>)
    %c6_i32_56 = arith.constant 6 : i32
    %c0_i32_57 = arith.constant 0 : i32
    %81 = tpu.memref_slice %arg2[%45, %c0_i32_57] : memref<4x128xf32, #tpu.memory_space<any>> -> memref<1x128xf32, #tpu.memory_space<any>>
    %c6_i32_58 = arith.constant 6 : i32
    %c0_i32_59 = arith.constant 0 : i32
    %82 = tpu.memref_slice %arg3[%c6_i32_58, %c0_i32_59] : memref<8x128xf32, #tpu.memory_space<vmem>> -> memref<1x128xf32, #tpu.memory_space<vmem>>
    %83 = tpu.memref_slice %arg4[%c6_i32_56] : memref<8x!tpu.dma_semaphore, #tpu.memory_space<semaphore_mem>> -> memref<1x!tpu.dma_semaphore, #tpu.memory_space<semaphore_mem>>
    %84 = tpu.memref_squeeze %83 : memref<1x!tpu.dma_semaphore, #tpu.memory_space<semaphore_mem>> -> memref<!tpu.dma_semaphore, #tpu.memory_space<semaphore_mem>>
    tpu.wait_dma2 semaphore(%84 : memref<!tpu.dma_semaphore, #tpu.memory_space<semaphore_mem>>) src(%81 : memref<1x128xf32, #tpu.memory_space<any>>) dst(%82 : memref<1x128xf32, #tpu.memory_space<vmem>>)
    %c7_i32_60 = arith.constant 7 : i32
    %c0_i32_61 = arith.constant 0 : i32
    %85 = tpu.memref_slice %arg2[%52, %c0_i32_61] : memref<4x128xf32, #tpu.memory_space<any>> -> memref<1x128xf32, #tpu.memory_space<any>>
    %c7_i32_62 = arith.constant 7 : i32
    %c0_i32_63 = arith.constant 0 : i32
    %86 = tpu.memref_slice %arg3[%c7_i32_62, %c0_i32_63] : memref<8x128xf32, #tpu.memory_space<vmem>> -> memref<1x128xf32, #tpu.memory_space<vmem>>
    %87 = tpu.memref_slice %arg4[%c7_i32_60] : memref<8x!tpu.dma_semaphore, #tpu.memory_space<semaphore_mem>> -> memref<1x!tpu.dma_semaphore, #tpu.memory_space<semaphore_mem>>
    %88 = tpu.memref_squeeze %87 : memref<1x!tpu.dma_semaphore, #tpu.memory_space<semaphore_mem>> -> memref<!tpu.dma_semaphore, #tpu.memory_space<semaphore_mem>>
    tpu.wait_dma2 semaphore(%88 : memref<!tpu.dma_semaphore, #tpu.memory_space<semaphore_mem>>) src(%85 : memref<1x128xf32, #tpu.memory_space<any>>) dst(%86 : memref<1x128xf32, #tpu.memory_space<vmem>>)
    return
  }
  func.func @transform_1(%arg0: i32, %arg1: memref<8xi32, #tpu.memory_space<smem>>) -> (i32, i32) {
    %c0_i32 = arith.constant 0 : i32
    %c0_i32_0 = arith.constant 0 : i32
    return %arg0, %c0_i32 : i32, i32
  }
}

</mosaic_0001>

<bundles_post_ra>
// kernel: _speaker_embedding_lookup.1
= control target key start
LH: loop header
LB: loop body
LE: loop exit
PB: predicated region body
PF: predicated region fallthrough
CT: control target
= control target key end

     0   :  { %s712_s0 = inlined_call_operand.vmem [shape: s32[8], index: 0, kind: input, shape index: {}]   ;;  %s713_s1 = inlined_call_operand.vmem [shape: f32[4,128], index: 1, kind: input, shape index: {}]   ;;  %s714_s2 = inlined_call_operand.hbm [shape: f32[8,128], index: 2, kind: output, shape index: {}]  }
   0x1   :  { %s7_s11 = sshll.u32 %s712_s0, 4  ;;  %s8_s11 = int_to_ptr.vmem [resolvable:$true] %s7_s11 }
   0x2   :  { %s602_s12 = scalar_lea.vmem %s8_s11, 16  ;;  %p607_p1 = scmp.lt.s32.totalorder %s8_s11, %s8_s11 }
   0x3   :  { %p603_p0 = scmp.ne.s32.totalorder %s8_s11, %s602_s12  ;;  %p608_p2 = scmp.lt.s32.totalorder %s602_s12, %s602_s12 }
   0x5   :  { %p609_p3 = por %p608_p2, %p607_p1 }
   0x7   :  { %p610_p4 = pnand %p609_p3, %p603_p0 }
   0x9   :  { %613 = shalt.err (!%p610_p4)  }
   0xa   :  { %s656_s13 = smov [#allocation4]  }
   0xb   :  { %10 = dma.vmem_to_smem %s8_s11, 16, %s656_s13, [#allocation3] }
   0xc   :  { %636 = dma.done.wait [#allocation3], 16 }
   0xd   :  { %637 = vsyncadd [#allocation3], 4294967280 }
   0xe   :  { %12 = sfence }
   0xf   :  { %13 = vsyncpa [#allocation6], 0  ;;  %s15_s14 = sld [smem:[#allocation4]] }
  0x15   :  { %s16_s17 = scalar_lea.vmem %s713_s1, %s15_s14 }
  0x16   :  { %v34_v0 = vld [vmem:[%s16_s17] sm:$0x1] }
  0x17   :  { %35 = vst [vmem:[#allocation5] sm:$0x1] %v34_v0 }
  0x18   :  { %60 = vsyncadd [#allocation2], 16  ;;  %s585_s0 = sld [smem:[#allocation4 + $0x1]] }
  0x1e   :  { %s63_s20 = scalar_lea.vmem %s713_s1, %s585_s0 }
  0x1f   :  { %v83_v1 = vld [vmem:[%s63_s20] sm:$0x1] }
  0x20   :  { %84 = vst [vmem:[#allocation5 + $0x1] sm:$0x1] %v83_v1 }
  0x21   :  { %109 = vsyncadd [#allocation2 + $0x1], 16  ;;  %s586_s21 = sld [smem:[#allocation4 + $0x2]] }
  0x27   :  { %s112_s24 = scalar_lea.vmem %s713_s1, %s586_s21 }
  0x28   :  { %v132_v2 = vld [vmem:[%s112_s24] sm:$0x1] }
  0x29   :  { %133 = vst [vmem:[#allocation5 + $0x2] sm:$0x1] %v132_v2 }
  0x2a   :  { %158 = vsyncadd [#allocation2 + $0x2], 16  ;;  %s587_s25 = sld [smem:[#allocation4 + $0x3]] }
  0x30   :  { %s161_s28 = scalar_lea.vmem %s713_s1, %s587_s25 }
  0x31   :  { %v181_v3 = vld [vmem:[%s161_s28] sm:$0x1] }
  0x32   :  { %182 = vst [vmem:[#allocation5 + $0x3] sm:$0x1] %v181_v3 }
  0x33   :  { %207 = vsyncadd [#allocation2 + $0x3], 16  ;;  %s588_s29 = sld [smem:[#allocation4 + $0x4]] }
  0x39   :  { %s210_s4 = scalar_lea.vmem %s713_s1, %s588_s29 }
  0x3a   :  { %v230_v4 = vld [vmem:[%s210_s4] sm:$0x1] }
  0x3b   :  { %231 = vst [vmem:[#allocation5 + $0x4] sm:$0x1] %v230_v4 }
  0x3c   :  { %256 = vsyncadd [#allocation2 + $0x4], 16  ;;  %s589_s5 = sld [smem:[#allocation4 + $0x5]] }
  0x42   :  { %s259_s8 = scalar_lea.vmem %s713_s1, %s589_s5 }
  0x43   :  { %v279_v5 = vld [vmem:[%s259_s8] sm:$0x1] }
  0x44   :  { %280 = vst [vmem:[#allocation5 + $0x5] sm:$0x1] %v279_v5 }
  0x45   :  { %305 = vsyncadd [#allocation2 + $0x5], 16  ;;  %s590_s9 = sld [smem:[#allocation4 + $0x6]] }
  0x4b   :  { %s308_s12 = scalar_lea.vmem %s713_s1, %s590_s9 }
  0x4c   :  { %v328_v6 = vld [vmem:[%s308_s12] sm:$0x1] }
  0x4d   :  { %329 = vst [vmem:[#allocation5 + $0x6] sm:$0x1] %v328_v6 }
  0x4e   :  { %354 = vsyncadd [#allocation2 + $0x6], 16  ;;  %s591_s13 = sld [smem:[#allocation4 + $0x7]] }
  0x54   :  { %s357_s16 = scalar_lea.vmem %s713_s1, %s591_s13 }
  0x55   :  { %v377_v7 = vld [vmem:[%s357_s16] sm:$0x1] }
  0x56   :  { %378 = vst [vmem:[#allocation5 + $0x7] sm:$0x1] %v377_v7 }
  0x57   :  { %403 = vsyncadd [#allocation2 + $0x7], 16 }
  0x58   :  { %638 = dma.done.wait [#allocation2], 16 }
  0x59   :  { %639 = vsyncadd [#allocation2], 4294967280 }
  0x5a   :  { %640 = dma.done.wait [#allocation2 + $0x1], 16 }
  0x5b   :  { %641 = vsyncadd [#allocation2 + $0x1], 4294967280 }
  0x5c   :  { %642 = dma.done.wait [#allocation2 + $0x2], 16 }
  0x5d   :  { %643 = vsyncadd [#allocation2 + $0x2], 4294967280 }
  0x5e   :  { %644 = dma.done.wait [#allocation2 + $0x3], 16 }
  0x5f   :  { %645 = vsyncadd [#allocation2 + $0x3], 4294967280 }
  0x60   :  { %646 = dma.done.wait [#allocation2 + $0x4], 16 }
  0x61   :  { %647 = vsyncadd [#allocation2 + $0x4], 4294967280 }
  0x62   :  { %648 = dma.done.wait [#allocation2 + $0x5], 16 }
  0x63   :  { %649 = vsyncadd [#allocation2 + $0x5], 4294967280 }
  0x64   :  { %650 = dma.done.wait [#allocation2 + $0x6], 16 }
  0x65   :  { %651 = vsyncadd [#allocation2 + $0x6], 4294967280 }
  0x66   :  { %652 = dma.done.wait [#allocation2 + $0x7], 16 }
  0x67   :  { %653 = vsyncadd [#allocation2 + $0x7], 4294967280  ;;  %s657_s1 = smov [#allocation5]  }
  0x68   :  { %s427_s17 = sshll.u32 %s657_s1, 4  ;;  %s428_s17 = int_to_ptr.vmem [resolvable:$true] %s427_s17 }
  0x69   :  { %s614_s0 = scalar_lea.vmem %s428_s17, 128  ;;  %p619_p6 = scmp.lt.s32.totalorder %s428_s17, %s428_s17 }
  0x6a   :  { %p615_p5 = scmp.ne.s32.totalorder %s428_s17, %s614_s0  ;;  %p620_p7 = scmp.lt.s32.totalorder %s614_s0, %s614_s0 }
  0x6c   :  { %p621_p8 = por %p620_p7, %p619_p6 }
  0x6e   :  { %p622_p9 = pnand %p621_p8, %p615_p5 }
  0x70   :  { %625 = shalt.err (!%p622_p9)
}
  0x71   :  { %s626_s20 = scalar_lea.hbm %s714_s2, 128 }
  0x72   :  { %p627_p10 = scmp.ne.s32.totalorder %s714_s2, %s626_s20  ;;  %p630_p11 = scmp.lt.u32.totalorder %s626_s20, %s714_s2 }
  0x74   :  { %p632_p12 = pnand %p630_p11, %p627_p10 }
  0x76   :  { %635 = shalt.err (!%p632_p12)
}
  0x77   :  { %430 = dma.vmem_to_hbm [thread:$0]  %s428_s17, 128, %s714_s2, [#allocation6]  }
  0x78   :  { %654 = dma.done.wait [#allocation6], 128  }
  0x79   :  { %655 = vsyncadd [#allocation6], 4294967168 }
  0x7a   :  { %434 = vsyncpa [#allocation6], 1 }
  0x7b   :  { %435 = vsyncmov [#allocation2] }
  0x7e   :  { %s436_s27 = vpop.sfrf %435 }
  0x7f   :  { %p592_p13 = scmp.ne.s32.totalorder %s436_s27, 0 }
  0x81   :  { %440 = shalt.err (%p592_p13)  }
  0x82   :  { %442 = vsyncmov [#allocation2 + $0x1] }
  0x85   :  { %s443_s28 = vpop.sfrf %442 }
  0x86   :  { %p593_p0 = scmp.ne.s32.totalorder %s443_s28, 0 }
  0x88   :  { %447 = shalt.err (%p593_p0)  }
  0x89   :  { %449 = vsyncmov [#allocation2 + $0x2] }
  0x8c   :  { %s450_s29 = vpop.sfrf %449 }
  0x8d   :  { %p594_p1 = scmp.ne.s32.totalorder %s450_s29, 0 }
  0x8f   :  { %454 = shalt.err (%p594_p1)  }
  0x90   :  { %456 = vsyncmov [#allocation2 + $0x3] }
  0x93   :  { %s457_s30 = vpop.sfrf %456 }
  0x94   :  { %p595_p2 = scmp.ne.s32.totalorder %s457_s30, 0 }
  0x96   :  { %461 = shalt.err (%p595_p2)  }
  0x97   :  { %463 = vsyncmov [#allocation2 + $0x4] }
  0x9a   :  { %s464_s2 = vpop.sfrf %463 }
  0x9b   :  { %p596_p3 = scmp.ne.s32.totalorder %s464_s2, 0 }
  0x9d   :  { %468 = shalt.err (%p596_p3)  }
  0x9e   :  { %470 = vsyncmov [#allocation2 + $0x5] }
  0xa1   :  { %s471_s3 = vpop.sfrf %470 }
  0xa2   :  { %p597_p4 = scmp.ne.s32.totalorder %s471_s3, 0 }
  0xa4   :  { %475 = shalt.err (%p597_p4)  }
  0xa5   :  { %477 = vsyncmov [#allocation2 + $0x6] }
  0xa8   :  { %s478_s4 = vpop.sfrf %477 }
  0xa9   :  { %p598_p5 = scmp.ne.s32.totalorder %s478_s4, 0 }
  0xab   :  { %482 = shalt.err (%p598_p5)  }
  0xac   :  { %484 = vsyncmov [#allocation2 + $0x7] }
  0xaf   :  { %s485_s5 = vpop.sfrf %484 }
  0xb0   :  { %p599_p6 = scmp.ne.s32.totalorder %s485_s5, 0 }
  0xb2   :  { %489 = shalt.err (%p599_p6)  }

</bundles_post_ra>
